<compile_context>
chip_gen: v6e
topology: v6e:2x2x1
jax: 0.10.0
libtpu: 0.0.40
codegen_flags: <defaults>
</compile_context>

<pallas_src>
import functools
import math

import jax
import jax.numpy as jnp
import numpy as np
from jax.experimental import pallas as pl
from jax.experimental.pallas import tpu as pltpu


# ----------------------------- fused Pallas kernel -----------------------------

def _patch_embed_kernel(x_ref, w_ref, b_ref, g_ref, beta_ref, o_ref, *, apply_norm, eps):
    # (tm, K) bf16 @ (K, E) bf16 -> f32 on the MXU
    acc = jnp.dot(x_ref[...], w_ref[...], preferred_element_type=jnp.float32)
    acc = acc + b_ref[...]                               # conv bias, f32
    if apply_norm:
        # Single-pass LayerNorm: var = E[x^2] - mu^2, gamma folded into the scale.
        mu = jnp.mean(acc, axis=-1, keepdims=True)
        ms = jnp.mean(acc * acc, axis=-1, keepdims=True)
        var = ms - mu * mu
        scale = g_ref[...] * jax.lax.rsqrt(var + eps)    # rsqrt -> EUP
        acc = acc * scale + (beta_ref[...] - mu * scale)
    o_ref[...] = acc.astype(o_ref.dtype)                 # bf16 store (lane-dense when E%128==0)


def _vmem_budget_bytes():
    """Conservative per-kernel VMEM budget, safe on v5e/v6e (128 MiB) and v7x (64 MiB)."""
    try:
        cap = pltpu.get_tpu_info().vmem_capacity_bytes
    except Exception:
        cap = 64 * 1024 * 1024
    return min(cap // 4, 24 * 1024 * 1024)


def _tile_working_set_bytes(tm, K, E, out_itemsize):
    """Honest VMEM accounting for one grid step."""
    return (2 * tm * K * 2          # x tile: double-buffered bf16
            + K * E * 2             # weight: resident (constant index_map), single-counted
            + 2 * tm * E * out_itemsize   # out tile: double-buffered
            + 3 * tm * E * 4        # f32 accumulator + epilogue temporaries
            + 4 * E * 4)            # bias / gamma / beta rows


def _pick_row_tile(M, K, E, budget_bytes, out_itemsize, *, min_steps=8):
    """Largest row tile (multiple of 8) that fits the VMEM budget, prefers to divide M
    exactly (no masked tail) and leaves at least `min_steps` grid steps for pipelining
    (>= 4 per v7x TensorCore)."""
    candidates = [512, 256, 128, 64, 32, 16, 8]
    fitting = [tm for tm in candidates
               if _tile_working_set_bytes(tm, K, E, out_itemsize) <= budget_bytes]
    if not fitting:
        fitting = [8]
    m8 = max(8, ((M + 7) // 8) * 8)

    def ok_steps(tm):
        return pl.cdiv(M, tm) >= min_steps

    for tm in fitting:                       # descending: largest tile that divides M + deep grid
        if M % tm == 0 and ok_steps(tm):
            return min(tm, m8)
    for tm in fitting:                       # deep grid even with a masked tail
        if ok_steps(tm):
            return min(tm, m8)
    for tm in fitting:                       # small problem: best divisor
        if M % tm == 0:
            return min(tm, m8)
    return min(fitting[0], m8)


def pallas_patch_embed(x, w_kn_bf16, bias, gamma, beta, *, patch_size, apply_norm,
                       eps=1e-5, out_dtype=jnp.bfloat16):
    """x: (B, Cin, H, W, D); w_kn_bf16: (Cin*p^3, E) bf16; returns (B, L, E) `out_dtype`."""
    B, Cin, H, W, D = x.shape
    p = patch_size
    K, E = w_kn_bf16.shape

    # Cast to bf16 FIRST so the unfold transpose (an XLA HBM round trip) moves bf16.
    xb = x.astype(jnp.bfloat16)
    # Non-overlapping patch unfold; token order over (oh, ow, od) and the (Cin, ph, pw, pd)
    # flattening match `proj(x).flatten(2).transpose(1, 2)` of the reference Conv3d exactly.
    xp = xb.reshape(B, Cin, H // p, p, W // p, p, D // p, p)
    xp = jnp.transpose(xp, (0, 2, 4, 6, 1, 3, 5, 7))
    L = (H // p) * (W // p) * (D // p)
    M = B * L
    x2d = xp.reshape(M, K)                                   # free reshape (contiguous)

    out_itemsize = jnp.dtype(out_dtype).itemsize
    budget = _vmem_budget_bytes()
    tm = _pick_row_tile(M, K, E, budget, out_itemsize)
    grid = (pl.cdiv(M, tm),)                                 # no wrapper padding; Pallas masks tail

    b2 = bias.reshape(1, E).astype(jnp.float32)
    g2 = gamma.reshape(1, E).astype(jnp.float32)
    bt2 = beta.reshape(1, E).astype(jnp.float32)

    cost = pl.CostEstimate(
        flops=2 * M * K * E,
        transcendentals=M if apply_norm else 0,
        bytes_accessed=M * K * 2 + K * E * 2 + 3 * E * 4 + M * E * out_itemsize,
    )

    out = pl.pallas_call(
        functools.partial(_patch_embed_kernel, apply_norm=apply_norm, eps=eps),
        out_shape=jax.ShapeDtypeStruct((M, E), out_dtype),
        grid=grid,
        in_specs=[
            pl.BlockSpec((tm, K), lambda i: (i, 0)),          # patch rows, pipelined
            pl.BlockSpec((K, E), lambda i: (0, 0)),           # weight resident in VMEM
            pl.BlockSpec((1, E), lambda i: (0, 0)),           # bias
            pl.BlockSpec((1, E), lambda i: (0, 0)),           # LN gamma
            pl.BlockSpec((1, E), lambda i: (0, 0)),           # LN beta
        ],
        out_specs=pl.BlockSpec((tm, E), lambda i: (i, 0)),
        compiler_params=pltpu.CompilerParams(
            dimension_semantics=("parallel",),
            vmem_limit_bytes=budget,                          # consistent with the picker budget
        ),
        cost_estimate=cost,
    )(x2d, w_kn_bf16, b2, g2, bt2)

    return out.reshape(B, L, E)                               # free reshape, no slice


# ----------------------------- params / forward / reference -----------------------------

def init_patch_embed_params(key, in_chans, embed_dim, patch_size):
    K = in_chans * patch_size ** 3
    kw, kb = jax.random.split(key)
    bound = 1.0 / math.sqrt(K)                                # PyTorch Conv3d default init range
    w_conv = jax.random.uniform(kw, (embed_dim, in_chans, patch_size, patch_size, patch_size),
                                jnp.float32, -bound, bound)
    b = jax.random.uniform(kb, (embed_dim,), jnp.float32, -bound, bound)
    # Pre-transposed (K, E) bf16 weight: no per-forward transpose, bf16-native MXU operand.
    w_kn = jnp.asarray(np.asarray(w_conv).reshape(embed_dim, K).T, jnp.bfloat16)
    return dict(
        w_kn=w_kn,
        b=b,
        norm_w=jnp.ones((embed_dim,), jnp.float32),
        norm_b=jnp.zeros((embed_dim,), jnp.float32),
    )


def patch_embedding_forward(params, x, *, patch_size, with_norm=True):
    return pallas_patch_embed(
        x, params["w_kn"], params["b"], params["norm_w"], params["norm_b"],
        patch_size=patch_size, apply_norm=with_norm)


def reference_patch_embed(params, x, *, patch_size, with_norm=True, eps=1e-5,
                          out_dtype=jnp.bfloat16):
    """Plain-JAX reference with identical bf16 operand / output rounding."""
    B, Cin, H, W, D = x.shape
    p = patch_size
    K, E = params["w_kn"].shape
    xp = x.astype(jnp.bfloat16).astype(jnp.float32)
    xp = xp.reshape(B, Cin, H // p, p, W // p, p, D // p, p)
    xp = jnp.transpose(xp, (0, 2, 4, 6, 1, 3, 5, 7)).reshape(B, -1, K)
    wb = params["w_kn"].astype(jnp.float32)
    out = jnp.einsum("blk,ke->ble", xp, wb) + params["b"]
    if with_norm:
        mu = out.mean(-1, keepdims=True)
        var = ((out - mu) ** 2).mean(-1, keepdims=True)
        out = (out - mu) * jax.lax.rsqrt(var + eps) * params["norm_w"] + params["norm_b"]
    return out.astype(out_dtype)


# ----------------------------- main -----------------------------

if __name__ == "__main__":
    patch_size = 4
    in_chans = 3
    embed_dim = 128                 # multiple of 128 -> lane-dense stored output
    B = 2
    img = (32, 32, 32)              # -> 8*8*8 = 512 tokens/image; M = 1024 rows
                                    #    (tile picker -> tm=128, grid=8: deep pipeline,
                                    #     no padding, no tail masking)

    key = jax.random.PRNGKey(0)
    kx, kp = jax.random.split(key)
    x = jax.random.normal(kx, (B, in_chans, *img), jnp.float32)
    params = init_patch_embed_params(kp, in_chans, embed_dim, patch_size)

    fwd = jax.jit(functools.partial(patch_embedding_forward,
                                    patch_size=patch_size, with_norm=True))
    out = fwd(params, x)
    jax.block_until_ready(out)

    L = (img[0] // patch_size) * (img[1] // patch_size) * (img[2] // patch_size)
    assert out.shape == (B, L, embed_dim), out.shape

    ref = reference_patch_embed(params, x, patch_size=patch_size, with_norm=True)
    err = float(jnp.max(jnp.abs(out.astype(jnp.float32) - ref.astype(jnp.float32))))
    assert err < 5e-2, f"max abs err {err}"

    print("KERNEL_OK")
</pallas_src>

<mosaic_0001>
module attributes {stable_mosaic.version = 11 : i64} {
  func.func @_patch_embed_kernel(%arg0: i32, %arg1: memref<128x192xbf16, #tpu.memory_space<vmem>>, %arg2: memref<192x128xbf16, #tpu.memory_space<vmem>>, %arg3: memref<1x128xf32, #tpu.memory_space<vmem>>, %arg4: memref<1x128xf32, #tpu.memory_space<vmem>>, %arg5: memref<1x128xf32, #tpu.memory_space<vmem>>, %arg6: memref<128x128xbf16, #tpu.memory_space<vmem>>) attributes {dimension_semantics = [#tpu.dimension_semantics<parallel>], iteration_bounds = array<i64: 8>, scalar_prefetch = 0 : i64, scratch_operands = 0 : i64, tpu.core_type = #tpu.core_type<tc>, window_params = [{transform_indices = @transform_0, window_bounds = array<i64: 128, 192>}, {pipeline_mode = #tpu.pipeline_mode<synchronous>, transform_indices = @transform_1, window_bounds = array<i64: 192, 128>}, {pipeline_mode = #tpu.pipeline_mode<synchronous>, transform_indices = @transform_2, window_bounds = array<i64: 1, 128>}, {pipeline_mode = #tpu.pipeline_mode<synchronous>, transform_indices = @transform_3, window_bounds = array<i64: 1, 128>}, {pipeline_mode = #tpu.pipeline_mode<synchronous>, transform_indices = @transform_4, window_bounds = array<i64: 1, 128>}, {transform_indices = @transform_5, window_bounds = array<i64: 128, 128>}]} {
    %c0 = arith.constant 0 : index
    %c0_0 = arith.constant 0 : index
    %0 = vector.load %arg1[%c0, %c0_0] : memref<128x192xbf16, #tpu.memory_space<vmem>>, vector<128x192xbf16>
    %c0_1 = arith.constant 0 : index
    %c0_2 = arith.constant 0 : index
    %1 = vector.load %arg2[%c0_1, %c0_2] : memref<192x128xbf16, #tpu.memory_space<vmem>>, vector<192x128xbf16>
    %cst = arith.constant dense<0.000000e+00> : vector<128x128xf32>
    %2 = tpu.matmul %0, %1, %cst {dimension_numbers = #tpu.dot_dimension_numbers<[1], [0], [0], [1], [0, 0, 1, 1], [], []>} : vector<128x192xbf16>, vector<192x128xbf16>, vector<128x128xf32> -> vector<128x128xf32>
    %c0_3 = arith.constant 0 : index
    %c0_4 = arith.constant 0 : index
    %3 = vector.load %arg3[%c0_3, %c0_4] : memref<1x128xf32, #tpu.memory_space<vmem>>, vector<1x128xf32>
    %4 = vector.broadcast %3 : vector<1x128xf32> to vector<128x128xf32>
    %5 = arith.addf %2, %4 : vector<128x128xf32>
    %cst_5 = arith.constant dense<0.000000e+00> : vector<128xf32>
    %6 = vector.multi_reduction <add>, %5, %cst_5 [1] : vector<128x128xf32> to vector<128xf32>
    %7 = vector.shape_cast %6 : vector<128xf32> to vector<128x1xf32>
    %cst_6 = arith.constant 1.280000e+02 : f32
    %8 = vector.broadcast %cst_6 : f32 to vector<128x1xf32>
    %9 = arith.divf %7, %8 : vector<128x1xf32>
    %10 = arith.mulf %5, %5 : vector<128x128xf32>
    %cst_7 = arith.constant dense<0.000000e+00> : vector<128xf32>
    %11 = vector.multi_reduction <add>, %10, %cst_7 [1] : vector<128x128xf32> to vector<128xf32>
    %12 = vector.shape_cast %11 : vector<128xf32> to vector<128x1xf32>
    %cst_8 = arith.constant 1.280000e+02 : f32
    %13 = vector.broadcast %cst_8 : f32 to vector<128x1xf32>
    %14 = arith.divf %12, %13 : vector<128x1xf32>
    %15 = arith.mulf %9, %9 : vector<128x1xf32>
    %16 = arith.subf %14, %15 : vector<128x1xf32>
    %c0_9 = arith.constant 0 : index
    %c0_10 = arith.constant 0 : index
    %17 = vector.load %arg4[%c0_9, %c0_10] : memref<1x128xf32, #tpu.memory_space<vmem>>, vector<1x128xf32>
    %cst_11 = arith.constant 9.99999974E-6 : f32
    %18 = vector.broadcast %cst_11 : f32 to vector<128x1xf32>
    %19 = arith.addf %16, %18 : vector<128x1xf32>
    %20 = math.rsqrt %19 : vector<128x1xf32>
    %21 = vector.broadcast %17 : vector<1x128xf32> to vector<128x128xf32>
    %22 = vector.broadcast %20 : vector<128x1xf32> to vector<128x128xf32>
    %23 = arith.mulf %21, %22 : vector<128x128xf32>
    %24 = arith.mulf %5, %23 : vector<128x128xf32>
    %c0_12 = arith.constant 0 : index
    %c0_13 = arith.constant 0 : index
    %25 = vector.load %arg5[%c0_12, %c0_13] : memref<1x128xf32, #tpu.memory_space<vmem>>, vector<1x128xf32>
    %26 = vector.broadcast %9 : vector<128x1xf32> to vector<128x128xf32>
    %27 = arith.mulf %26, %23 : vector<128x128xf32>
    %28 = vector.broadcast %25 : vector<1x128xf32> to vector<128x128xf32>
    %29 = arith.subf %28, %27 : vector<128x128xf32>
    %30 = arith.addf %24, %29 : vector<128x128xf32>
    %31 = arith.truncf %30 : vector<128x128xf32> to vector<128x128xbf16>
    %c0_14 = arith.constant 0 : index
    %c0_15 = arith.constant 0 : index
    %32 = vector.load %arg6[%c0_14, %c0_15] : memref<128x128xbf16, #tpu.memory_space<vmem>>, vector<128x128xbf16>
    tpu.vector_store %arg6[%c0_14, %c0_15], %31 {strides = array<i32>} : memref<128x128xbf16, #tpu.memory_space<vmem>>, vector<128x128xbf16>,
    return
  }
  func.func @transform_0(%arg0: i32) -> (i32, i32) {
    %c0_i32 = arith.constant 0 : i32
    %c0_i32_0 = arith.constant 0 : i32
    return %arg0, %c0_i32 : i32, i32
  }
  func.func @transform_1(%arg0: i32) -> (i32, i32) {
    %c0_i32 = arith.constant 0 : i32
    %c0_i32_0 = arith.constant 0 : i32
    %c0_i32_1 = arith.constant 0 : i32
    return %c0_i32, %c0_i32_0 : i32, i32
  }
  func.func @transform_2(%arg0: i32) -> (i32, i32) {
    %c0_i32 = arith.constant 0 : i32
    %c0_i32_0 = arith.constant 0 : i32
    %c0_i32_1 = arith.constant 0 : i32
    return %c0_i32, %c0_i32_0 : i32, i32
  }
  func.func @transform_3(%arg0: i32) -> (i32, i32) {
    %c0_i32 = arith.constant 0 : i32
    %c0_i32_0 = arith.constant 0 : i32
    %c0_i32_1 = arith.constant 0 : i32
    return %c0_i32, %c0_i32_0 : i32, i32
  }
  func.func @transform_4(%arg0: i32) -> (i32, i32) {
    %c0_i32 = arith.constant 0 : i32
    %c0_i32_0 = arith.constant 0 : i32
    %c0_i32_1 = arith.constant 0 : i32
    return %c0_i32, %c0_i32_0 : i32, i32
  }
  func.func @transform_5(%arg0: i32) -> (i32, i32) {
    %c0_i32 = arith.constant 0 : i32
    %c0_i32_0 = arith.constant 0 : i32
    return %arg0, %c0_i32 : i32, i32
  }
}

</mosaic_0001>

<bundles_post_ra>
// kernel: patch_embedding_forward.1
= control target key start
LH: loop header
LB: loop body
LE: loop exit
PB: predicated region body
PF: predicated region fallthrough
CT: control target
= control target key end

     0   :  { %10 = vsyncpa [#allocation3], 0  ;;  %s1774_s0 = inlined_call_operand.vmem [shape: bf16[1024,192], index: 0, kind: input, shape index: {}]   ;;  %s1775_s1 = inlined_call_operand.vmem [shape: bf16[192,128], index: 1, kind: input, shape index: {}]   ;;  %s1776_s2 = inlined_call_operand.vmem [shape: f32[1,128], index: 2, kind: input, shape index: {}]   ;;  %s1777_s3 = inlined_call_operand.vmem [shape: f32[1,128], index: 3, kind: input, shape index: {}]   ;;  %s1778_s4 = inlined_call_operand.vmem [shape: f32[1,128], index: 4, kind: input, shape index: {}]   ;;  %s1779_s5 = inlined_call_operand.hbm [shape: bf16[1024,128], index: 5, kind: output, shape index: {}]  }
   0x1   :  { %12 = vsyncpa [#allocation3 + $0x1], 0  ;;  %s1333_s18 = smov 0   ;;  %s1335_s19 = smov 0  }
   0x2   :  { %s1337_s20 = smov 0   ;;  %s1339_s21 = smov 0  }
   0x3 LB: > { %s1354_s22 = sadd.s32 4294967295, %s1297_s21   ;;  %s970_s23 = sadd.s32 4294967294, %s1297_s21   ;;  %s1297_s21 = sphi %s1339_s21, %s1785_s21   ;;  %s1293_s20 = sphi %s1337_s20, %s1784_s20   ;;  %s1289_s19 = sphi %s1335_s19, %s1783_s19   ;;  %s1285_s18 = sphi %s1333_s18, %s1782_s18  }
   0x4   : > { %s1358_s24 = sadd.s32 1, %s1297_s21   ;;  %s135_s25 = sadd.s32 1, %s1293_s20 }
   0x5   : > { %s132_s26 = ssub.s32 %s1297_s21, %s1358_s24  ;;  %p145_p0 = scmp.ne.s32.totalorder %s1293_s20, %s1289_s19 }
   0x6   : > { %p133_p1 = scmp.eq.s32.totalorder %s132_s26, 0  ;;  %p146_p2 = scmp.eq.s32.totalorder %s1354_s22, 7 }
   0x7   : > { %p151_p3 = scmp.ne.s32.totalorder %s1289_s19, %s1285_s18  ;;  %p152_p4 = scmp.eq.s32.totalorder %s970_s23, 7 }
   0x8   : > { %s1369_s27 = scalar_select %p133_p1, %s1293_s20, %s135_s25  }
   0x9   : > { %p1371_p5 = por %p146_p2, %p145_p0  ;;  %p1375_p6 = por %p152_p4, %p151_p3 }
   0xa   : > { %p973_p7 = scmp.ge.s32.totalorder %s1297_s21, 1  ;;  %p192_p8 = scmp.lt.s32.totalorder %s1297_s21, 9 }
   0xc   : > { %p193_p9 = pnand %p973_p7, %p192_p8 }
   0xd   : > { %s975_s7 = sshll.u32 (!%p193_p9), %s1354_s22, 4  ;;  %s218_s6 = sand.u32 (!%p193_p9), 1, %s1289_s19  }
   0xe   : > { %196 = sbr.rel (%p193_p9) target bundleno = 509 (0x1fd), region = 40  ;;  %p222_p10 = scmp.lt.s32.totalorder (!%p193_p9), %s975_s7, 127 }
   0xf   : > { %s974_s9 = sshll.u32 (!%p193_p9), %s218_s6, 6  ;;  %s1055_s11 = sshll.u32 (!%p193_p9), %s1354_s22, 10 }
  0x10   : > { %s1641_s10 = scalar_lea.vmem (!%p193_p9), [#allocation2], %s974_s9  ;;  %s1727_s15 = scalar_lea.hbm (!%p193_p9), %s1779_s5, %s1055_s11 }
  0x11   : > { %s1734_s16 = scalar_lea.sflag (!%p193_p9), [#allocation3], %s218_s6  ;;  %s1300_s23 = smov (!%p193_p9), [#allocation2]  }
  0x12   : > { %s1241_s25 = sshll.u32 (!%p193_p9), %s1300_s23, 4  ;;  %s1242_s25 = int_to_ptr.vmem [resolvable:$false] %s1241_s25 }
  0x13   : > { %v1169_v0 = vld [vmem:[%s1775_s1 + $0x38] sm:$0xff]   ;;  %v1299_v1 = vmov 0   ;;  %v1170_v2 = vld [vmem:[%s1775_s1 + $0x30] sm:$0xff]   ;;  %s1787_s7 = smov (!%p222_p10, %s975_s7), 127  ;;  %v1171_v3 = vld [vmem:[%s1775_s1 + $0x28] sm:$0xff]   ;;  %vm421_vm0 = vcmask 523264  }
  0x14   : > { %446 = vmatprep.subr.bf16.mxu0 %v1299_v1  ;;  %1103 = vmatprep.subr.bf16.mxu1 %v1299_v1  ;;  %s1038_s12 = sshll.u32 %s1787_s7, 3  ;;  %v1172_v4 = vld [vmem:[%s1775_s1 + $0x20] sm:$0xff]   ;;  %v1173_v6 = vld [vmem:[%s1775_s1 + $0x18] sm:$0xff]   ;;  %v1174_v8 = vld [vmem:[%s1775_s1 + $0x10] sm:$0xff]   ;;  %s1243_s26 = scalar_lea.vmem %s1242_s25, 2048 }
  0x15   : > { %447 = vmatpush1.bf16.msra.mxu0 %v1169_v0  ;;  %1115 = vmatpush1.bf16.msra.mxu1 %v1169_v0  ;;  %s1403_s17 = scalar_lea.vmem %s1774_s0, %s1038_s12  ;;  %v1175_v9 = vld [vmem:[%s1775_s1 + $0x8] sm:$0xff]   ;;  %v1176_v10 = vld [vmem:[%s1775_s1] sm:$0xff]   ;;  %v1177_v11 = vld [vmem:[%s1775_s1 + $0x58] sm:$0xff]   ;;  %s908_s12 = sshll.u32 %s1641_s10, 4  ;;  %s1729_s12 = int_to_ptr.vmem [resolvable:$true] %s908_s12 }
  0x16   : > { %448 = vmatprep.subr.bf16.mxu0 %v1299_v1  ;;  %1104 = vmatprep.subr.bf16.mxu1 %v1299_v1  ;;  %v1183_v5 = vld [vmem:[%s1403_s17 + $0x4] ss:$8 sps:$4 sm:$0xff]   ;;  %v1178_v12 = vld [vmem:[%s1775_s1 + $0x50] sm:$0xff]   ;;  %v1181_v15 = vld [vmem:[%s1403_s17] ss:$8 sps:$4 sm:$0xff]   ;;  %s1237_s22 = scalar_lea.vmem %s1729_s12, 1024  ;;  %p1244_p0 = scmp.lt.s32.totalorder %s1729_s12, %s1242_s25 }
  0x17   : > { %v1186_v7 = vld [vmem:[%s1403_s17 + $0x44] ss:$8 sps:$4 sm:$0xff]   ;;  %1007 = vmatprep.mubr.msk.bf16.mxu0 %vm421_vm0, %v1183_v5  ;;  %v1184_v16 = vld [vmem:[%s1403_s17 + $0x40] ss:$8 sps:$4 sm:$0xff]   ;;  %v1187_v17 = vld [vmem:[%s1403_s17 + $0x14] ss:$8 sps:$4 sm:$0xff]   ;;  %p1238_p11 = scmp.ne.s32.totalorder %s1729_s12, %s1237_s22  ;;  %p1245_p1 = scmp.lt.s32.totalorder %s1243_s26, %s1237_s22 }
  0x18   : > { %1011 = vmatprep.mubr.msk.bf16.mxu1 %vm421_vm0, %v1186_v7  ;;  %v1179_v13 = vld [vmem:[%s1775_s1 + $0x48] sm:$0xff]   ;;  %v1180_v14 = vld [vmem:[%s1775_s1 + $0x40] sm:$0xff]   ;;  %v1190_v18 = vld [vmem:[%s1403_s17 + $0x54] ss:$8 sps:$4 sm:$0xff]  }
  0x19   : > { %449 = vmatpush1.bf16.msra.mxu0 %v1170_v2  ;;  %1116 = vmatpush1.bf16.msra.mxu1 %v1170_v2  ;;  %v1189_v19 = vld [vmem:[%s1403_s17 + $0x10] ss:$8 sps:$4 sm:$0xff]   ;;  %v1193_v21 = vld [vmem:[%s1403_s17 + $0x24] ss:$8 sps:$4 sm:$0xff]   ;;  %v1195_v23 = vld [vmem:[%s1403_s17 + $0x20] ss:$8 sps:$4 sm:$0xff]   ;;  %p1239_p12 = pnand %p1238_p11, %p1371_p5  ;;  %p1246_p2 = por %p1245_p1, %p1244_p0 }
  0x1a   : > { %450 = vmatprep.subr.bf16.mxu0 %v1299_v1  ;;  %1105 = vmatprep.subr.bf16.mxu1 %v1299_v1  ;;  %v1192_v20 = vld [vmem:[%s1403_s17 + $0x50] ss:$8 sps:$4 sm:$0xff]   ;;  %v1196_v22 = vld [vmem:[%s1403_s17 + $0x64] ss:$8 sps:$4 sm:$0xff]   ;;  %v1198_v24 = vld [vmem:[%s1403_s17 + $0x60] ss:$8 sps:$4 sm:$0xff]  }
  0x1b   : > { %v1199_v25 = vld [vmem:[%s1403_s17 + $0x34] ss:$8 sps:$4 sm:$0xff]   ;;  %v1201_v27 = vld [vmem:[%s1403_s17 + $0x30] ss:$8 sps:$4 sm:$0xff]   ;;  %v1474_v29 = vld [vmem:[%s1776_s2] ss:$0 sm:$0xff]  ;;  %p1240_p13 = pneg %p1239_p12 }
  0x1c   : > { %v1202_v26 = vld [vmem:[%s1403_s17 + $0x74] ss:$8 sps:$4 sm:$0xff]   ;;  %v1204_v28 = vld [vmem:[%s1403_s17 + $0x70] ss:$8 sps:$4 sm:$0xff]  }
  0x1d   : > { %451 = vmatpush1.bf16.msra.mxu0 %v1171_v3  ;;  %1117 = vmatpush1.bf16.msra.mxu1 %v1171_v3  ;;  %p1247_p3 = pnand %p1246_p2, %p1240_p13 }
  0x1e   : > { %452 = vmatprep.subr.bf16.mxu0 %v1299_v1  ;;  %1106 = vmatprep.subr.bf16.mxu1 %v1299_v1 }
  0x21   : > { %453 = vmatpush1.bf16.msra.mxu0 %v1172_v4  ;;  %1118 = vmatpush1.bf16.msra.mxu1 %v1172_v4 }
  0x22   : > { %454 = vmatprep.subr.bf16.mxu0 %v1299_v1  ;;  %1107 = vmatprep.subr.bf16.mxu1 %v1299_v1 }
  0x25   : > { %455 = vmatpush1.bf16.msra.mxu0 %v1173_v6  ;;  %1119 = vmatpush1.bf16.msra.mxu1 %v1173_v6 }
  0x26   : > { %456 = vmatprep.subr.bf16.mxu0 %v1299_v1  ;;  %1108 = vmatprep.subr.bf16.mxu1 %v1299_v1 }
  0x29   : > { %457 = vmatpush1.bf16.msra.mxu0 %v1174_v8  ;;  %1120 = vmatpush1.bf16.msra.mxu1 %v1174_v8 }
  0x2a   : > { %458 = vmatprep.subr.bf16.mxu0 %v1299_v1  ;;  %1109 = vmatprep.subr.bf16.mxu1 %v1299_v1 }
  0x2d   : > { %459 = vmatpush1.bf16.msra.mxu0 %v1175_v9  ;;  %1121 = vmatpush1.bf16.msra.mxu1 %v1175_v9 }
  0x2e   : > { %460 = vmatprep.subr.bf16.mxu0 %v1299_v1  ;;  %1110 = vmatprep.subr.bf16.mxu1 %v1299_v1 }
  0x31   : > { %461 = vmatpush1.bf16.msra.mxu0 %v1176_v10  ;;  %1122 = vmatpush1.bf16.msra.mxu1 %v1176_v10 }
  0x32   : > { %470 = vmatprep.subr.bf16.mxu0 %v1299_v1  ;;  %1111 = vmatprep.subr.bf16.mxu1 %v1299_v1 }
  0x35   : > { %471 = vmatpush2.bf16.msra.mxu0 %v1177_v11  ;;  %1123 = vmatpush2.bf16.msra.mxu1 %v1177_v11 }
  0x36   : > { %472 = vmatprep.subr.bf16.mxu0 %v1299_v1  ;;  %1112 = vmatprep.subr.bf16.mxu1 %v1299_v1 }
  0x39   : > { %473 = vmatpush2.bf16.msra.mxu0 %v1178_v12  ;;  %1124 = vmatpush2.bf16.msra.mxu1 %v1178_v12 }
  0x3a   : > { %474 = vmatprep.subr.bf16.mxu0 %v1299_v1  ;;  %1113 = vmatprep.subr.bf16.mxu1 %v1299_v1 }
  0x3d   : > { %475 = vmatpush2.bf16.msra.mxu0 %v1179_v13  ;;  %1125 = vmatpush2.bf16.msra.mxu1 %v1179_v13 }
  0x3e   : > { %476 = vmatprep.subr.bf16.mxu0 %v1299_v1  ;;  %1114 = vmatprep.subr.bf16.mxu1 %v1299_v1 }
  0x41   : > { %477 = vmatpush2.bf16.msra.mxu0 %v1180_v14  ;;  %1126 = vmatpush2.bf16.msra.mxu1 %v1180_v14 }
  0x44   : > { %479 = vmatmul.mubr.bf16.vlgmr.msra.gmra.mxu0 %v1181_v15  ;;  %511 = vmatmul.mubr.bf16.vlgmr.msra.gmra.mxu1 %v1184_v16 }
  0x45   : > { %1008 = vmatprep.mubr.msk.bf16.mxu0 %vm421_vm0, %v1187_v17  ;;  %1012 = vmatprep.mubr.msk.bf16.mxu1 %vm421_vm0, %v1190_v18 }
  0x4c   : > { %487 = vmatmul.mubr.bf16.gmra.mxu0 %v1189_v19  ;;  %519 = vmatmul.mubr.bf16.gmra.mxu1 %v1192_v20 }
  0x4d   : > { %1009 = vmatprep.mubr.msk.bf16.mxu0 %vm421_vm0, %v1193_v21  ;;  %1013 = vmatprep.mubr.msk.bf16.mxu1 %vm421_vm0, %v1196_v22 }
  0x54   : > { %495 = vmatmul.mubr.bf16.gmra.mxu0 %v1195_v23  ;;  %527 = vmatmul.mubr.bf16.gmra.mxu1 %v1198_v24 }
  0x55   : > { %1010 = vmatprep.mubr.msk.bf16.mxu0 %vm421_vm0, %v1199_v25  ;;  %1014 = vmatprep.mubr.msk.bf16.mxu1 %vm421_vm0, %v1202_v26 }
  0x5c   : > { %503 = vmatmul.mubr.bf16.gmra.mxu0 %v1201_v27  ;;  %535 = vmatmul.mubr.bf16.gmra.mxu1 %v1204_v28 }
 0x104   : > { %v480_v30 = vpop.f32.mrf.mxu0  ;;  %v512_v31 = vpop.f32.mrf.mxu1 }
 0x105   : > { %v1477_v32 = vadd.f32 %v1474_v29, %v480_v30  ;;  %v1481_v37 = vadd.f32 %v1474_v29, %v512_v31 }
 0x106   : > { %v482_v33 = vpop.f32.mrf.mxu0  ;;  %v514_v34 = vpop.f32.mrf.mxu1 }
 0x107   : > { %543 = vadd.xlane.f32.xlu0 %v1477_v32  ;;  %v592_v45 = vmul.f32 %v1477_v32, %v1477_v32  ;;  %v600_v51 = vmul.f32 %v1481_v37, %v1481_v37 }
 0x108   : > { %v483_v35 = vpop.f32.mrf.mxu0  ;;  %v515_v36 = vpop.f32.mrf.mxu1 }
 0x109   : > { %v1484_v38 = vadd.f32 %v1474_v29, %v483_v35  ;;  %v1487_v39 = vadd.f32 %v1474_v29, %v515_v36 }
 0x10a   : > { %v485_v40 = vpop.f32.mrf.mxu0  ;;  %v517_v41 = vpop.f32.mrf.mxu1 }
 0x10b   : > { %561 = vadd.xlane.f32.xlu1 %v1487_v39  ;;  %559 = vadd.xlane.f32.xlu0 %v1481_v37  ;;  %v593_v44 = vmul.f32 %v1484_v38, %v1484_v38  ;;  %v601_v50 = vmul.f32 %v1487_v39, %v1487_v39 }
 0x10c   : > { %v488_v42 = vpop.f32.mrf.mxu0  ;;  %v520_v43 = vpop.f32.mrf.mxu1 }
 0x10d   : > { %v1500_v54 = vadd.f32 %v1474_v29, %v488_v42  ;;  %v1503_v59 = vadd.f32 %v1474_v29, %v520_v43 }
 0x10e   : > { %v490_v46 = vpop.f32.mrf.mxu0  ;;  %v522_v47 = vpop.f32.mrf.mxu1 }
 0x10f   : > { %610 = vadd.xlane.f32.xlu1 %v593_v44  ;;  %608 = vadd.xlane.f32.xlu0 %v592_v45  ;;  %v594_v4 = vmul.f32 %v1500_v54, %v1500_v54  ;;  %v602_v10 = vmul.f32 %v1503_v59, %v1503_v59 }
 0x110   : > { %v491_v48 = vpop.f32.mrf.mxu0  ;;  %v523_v49 = vpop.f32.mrf.mxu1 }
 0x111   : > { %v1508_v62 = vadd.f32 %v1474_v29, %v491_v48  ;;  %v1513_v3 = vadd.f32 %v1474_v29, %v523_v49 }
 0x112   : > { %v493_v52 = vpop.f32.mrf.mxu0  ;;  %v525_v53 = vpop.f32.mrf.mxu1 }
 0x113   : > { %626 = vadd.xlane.f32.xlu1 %v601_v50  ;;  %624 = vadd.xlane.f32.xlu0 %v600_v51  ;;  %v595_v9 = vmul.f32 %v1508_v62, %v1508_v62  ;;  %v603_v14 = vmul.f32 %v1513_v3, %v1513_v3 }
 0x114   : > { %v496_v55 = vpop.f32.mrf.mxu0  ;;  %v528_v56 = vpop.f32.mrf.mxu1 }
 0x115   : > { %v1523_v13 = vadd.f32 %v1474_v29, %v496_v55  ;;  %v1528_v15 = vadd.f32 %v1474_v29, %v528_v56 }
 0x116   : > { %v498_v57 = vpop.f32.mrf.mxu0  ;;  %v530_v58 = vpop.f32.mrf.mxu1 }
 0x117   : > { %547 = vadd.xlane.f32.xlu1 %v1500_v54  ;;  %545 = vadd.xlane.f32.xlu0 %v1484_v38  ;;  %v596_v18 = vmul.f32 %v1523_v13, %v1523_v13  ;;  %v604_v20 = vmul.f32 %v1528_v15, %v1528_v15 }
 0x118   : > { %v499_v60 = vpop.f32.mrf.mxu0  ;;  %v531_v61 = vpop.f32.mrf.mxu1 }
 0x119   : > { %v1532_v16 = vadd.f32 %v1474_v29, %v499_v60  ;;  %v1537_v17 = vadd.f32 %v1474_v29, %v531_v61 }
 0x11a   : > { %v501_v63 = vpop.f32.mrf.mxu0  ;;  %v533_v0 = vpop.f32.mrf.mxu1 }
 0x11b   : > { %549 = vadd.xlane.f32.xlu1 %v1508_v62  ;;  %563 = vadd.xlane.f32.xlu0 %v1503_v59  ;;  %v597_v19 = vmul.f32 %v1532_v16, %v1532_v16  ;;  %v605_v22 = vmul.f32 %v1537_v17, %v1537_v17 }
 0x11c   : > { %v504_v1 = vpop.f32.mrf.mxu0  ;;  %v536_v2 = vpop.f32.mrf.mxu1 }
 0x11d   : > { %v1547_v21 = vadd.f32 %v1474_v29, %v504_v1  ;;  %v1552_v23 = vadd.f32 %v1474_v29, %v536_v2 }
 0x11e   : > { %v506_v5 = vpop.f32.mrf.mxu0  ;;  %v538_v6 = vpop.f32.mrf.mxu1 }
 0x11f   : > { %565 = vadd.xlane.f32.xlu1 %v1513_v3  ;;  %612 = vadd.xlane.f32.xlu0 %v594_v4  ;;  %v598_v26 = vmul.f32 %v1547_v21, %v1547_v21  ;;  %v606_v28 = vmul.f32 %v1552_v23, %v1552_v23 }
 0x120   : > { %v507_v7 = vpop.f32.mrf.mxu0  ;;  %v539_v8 = vpop.f32.mrf.mxu1 }
 0x121   : > { %v1556_v24 = vadd.f32 %v1474_v29, %v507_v7  ;;  %v1561_v25 = vadd.f32 %v1474_v29, %v539_v8 }
 0x122   : > { %v509_v11 = vpop.f32.mrf.mxu0  ;;  %v541_v12 = vpop.f32.mrf.mxu1 }
 0x123   : > { %614 = vadd.xlane.f32.xlu1 %v595_v9  ;;  %628 = vadd.xlane.f32.xlu0 %v602_v10  ;;  %v599_v27 = vmul.f32 %v1556_v24, %v1556_v24  ;;  %v607_v30 = vmul.f32 %v1561_v25, %v1561_v25 }
 0x127   : > { %630 = vadd.xlane.f32.xlu1 %v603_v14  ;;  %551 = vadd.xlane.f32.xlu0 %v1523_v13 }
 0x12b   : > { %553 = vadd.xlane.f32.xlu1 %v1532_v16  ;;  %567 = vadd.xlane.f32.xlu0 %v1528_v15 }
 0x12f   : > { %569 = vadd.xlane.f32.xlu1 %v1537_v17  ;;  %616 = vadd.xlane.f32.xlu0 %v596_v18 }
 0x133   : > { %618 = vadd.xlane.f32.xlu1 %v597_v19  ;;  %632 = vadd.xlane.f32.xlu0 %v604_v20  ;;  %v1599_v20 = vld [vmem:[%s1777_s3] ss:$0 sm:$0xff] }
 0x137   : > { %634 = vadd.xlane.f32.xlu1 %v605_v22  ;;  %555 = vadd.xlane.f32.xlu0 %v1547_v21 }
 0x13b   : > { %557 = vadd.xlane.f32.xlu1 %v1556_v24  ;;  %571 = vadd.xlane.f32.xlu0 %v1552_v23 }
 0x13f   : > { %573 = vadd.xlane.f32.xlu1 %v1561_v25  ;;  %620 = vadd.xlane.f32.xlu0 %v598_v26 }
 0x143   : > { %622 = vadd.xlane.f32.xlu1 %v599_v27  ;;  %636 = vadd.xlane.f32.xlu0 %v606_v28 }
 0x147   : > { %638 = vadd.xlane.f32.xlu1 %v607_v30 }
 0x190   : > { %v544_v29 = vpop.xlane.xlu0 %543 }
 0x191   : > { %v1572_v34 = vmul.f32 0.0078125, %v544_v29 }
 0x193   : > { %v656_v41 = vmul.f32 %v1572_v34, %v1572_v34 }
 0x194   : > { %v562_v31 = vpop.xlane.xlu1 %561  ;;  %v560_v33 = vpop.xlane.xlu0 %559 }
 0x195   : > { %v1574_v35 = vmul.f32 0.0078125, %v562_v31  ;;  %v1578_v42 = vmul.f32 0.0078125, %v560_v33 }
 0x197   : > { %v665_v45 = vmul.f32 %v1574_v35, %v1574_v35  ;;  %v664_v48 = vmul.f32 %v1578_v42, %v1578_v42 }
 0x198   : > { %v611_v36 = vpop.xlane.xlu1 %610  ;;  %v609_v40 = vpop.xlane.xlu0 %608 }
 0x199   : > { %v640_v43 = vmul.f32 0.0078125, %v609_v40  ;;  %v641_v61 = vmul.f32 0.0078125, %v611_v36 }
 0x19b   : > { %v672_v44 = vsub.f32 %v640_v43, %v656_v41 }
 0x19c   : > { %v627_v46 = vpop.xlane.xlu1 %626  ;;  %v625_v47 = vpop.xlane.xlu0 %624 }
 0x19d   : > { %v689_v49 = vadd.f32 1e-05, %v672_v44  ;;  %v649_v50 = vmul.f32 0.0078125, %v627_v46  ;;  %v648_v51 = vmul.f32 0.0078125, %v625_v47 }
 0x19f   : > { %v681_v52 = vsub.f32 %v649_v50, %v665_v45  ;;  %v680_v53 = vsub.f32 %v648_v51, %v664_v48  ;;  %1205 = vrsqrt.f32 %v689_v49 }
 0x1a0   : > { %v548_v55 = vpop.xlane.xlu1 %547  ;;  %v546_v56 = vpop.xlane.xlu0 %545 }
 0x1a1   : > { %v698_v57 = vadd.f32 1e-05, %v681_v52  ;;  %v697_v58 = vadd.f32 1e-05, %v680_v53  ;;  %v1584_v60 = vmul.f32 0.0078125, %v546_v56  ;;  %v1588_v2 = vmul.f32 0.0078125, %v548_v55 }
 0x1a2   : > { %v1617_v52 = vld [vmem:[%s1778_s4] ss:$0 sm:$0xff] }
 0x1a3   : > { %1207 = vrsqrt.f32 %v698_v57  ;;  %v657_v63 = vmul.f32 %v1584_v60, %v1584_v60  ;;  %v658_v8 = vmul.f32 %v1588_v2, %v1588_v2 }
 0x1a4   : > { %1209 = vrsqrt.f32 %v697_v58  ;;  %v550_v0 = vpop.xlane.xlu1 %549  ;;  %v564_v1 = vpop.xlane.xlu0 %563 }
 0x1a5   : > { %v673_v4 = vsub.f32 %v641_v61, %v657_v63  ;;  %v1592_v9 = vmul.f32 0.0078125, %v550_v0  ;;  %v1594_v11 = vmul.f32 0.0078125, %v564_v1 }
 0x1a7   : > { %v690_v5 = vadd.f32 1e-05, %v673_v4  ;;  %v659_v22 = vmul.f32 %v1592_v9, %v1592_v9  ;;  %v666_v30 = vmul.f32 %v1594_v11, %v1594_v11 }
 0x1a8   : > { %v566_v6 = vpop.xlane.xlu1 %565  ;;  %v613_v7 = vpop.xlane.xlu0 %612 }
 0x1a9   : > { %1211 = vrsqrt.f32 %v690_v5  ;;  %v642_v10 = vmul.f32 0.0078125, %v613_v7  ;;  %v1605_v29 = vmul.f32 0.0078125, %v566_v6 }
 0x1ab   : > { %v674_v12 = vsub.f32 %v642_v10, %v658_v8  ;;  %v667_v49 = vmul.f32 %v1605_v29, %v1605_v29 }
 0x1ac   : > { %v615_v14 = vpop.xlane.xlu1 %614  ;;  %v629_v18 = vpop.xlane.xlu0 %628 }
 0x1ad   : > { %v1206_v19 = vpop.eup %1205  ;;  %v691_v26 = vadd.f32 1e-05, %v674_v12  ;;  %v643_v27 = vmul.f32 0.0078125, %v615_v14  ;;  %v650_v28 = vmul.f32 0.0078125, %v629_v18 }
 0x1ae   : > { %v727_v36 = vmul.f32 %v1206_v19, %v1599_v20 }
 0x1af   : > { %1213 = vrsqrt.f32 %v691_v26  ;;  %v675_v31 = vsub.f32 %v643_v27, %v659_v22  ;;  %v682_v40 = vsub.f32 %v650_v28, %v666_v30 }
 0x1b0   : > { %v1208_v33 = vpop.eup %1207  ;;  %v631_v41 = vpop.xlane.xlu1 %630  ;;  %v760_v55 = vmul.f32 %v727_v36, %v1572_v34 }
 0x1b1   : > { %v552_v43 = vpop.xlane.xlu0 %551  ;;  %v1210_v44 = vpop.eup %1209  ;;  %v736_v45 = vmul.f32 %v1208_v33, %v1599_v20  ;;  %v692_v46 = vadd.f32 1e-05, %v675_v31  ;;  %v651_v47 = vmul.f32 0.0078125, %v631_v41  ;;  %v699_v50 = vadd.f32 1e-05, %v682_v40 }
 0x1b2   : > { %v735_v48 = vmul.f32 %v1210_v44, %v1599_v20  ;;  %v782_v7 = vsub.f32 %v1617_v52, %v760_v55 }
 0x1b3   : > { %v769_v51 = vmul.f32 %v736_v45, %v1574_v35  ;;  %1215 = vrsqrt.f32 %v692_v46  ;;  %v683_v56 = vsub.f32 %v651_v47, %v667_v49  ;;  %v752_v61 = vmul.f32 %v736_v45, %v1487_v39 }
 0x1b4   : > { %v768_v53 = vmul.f32 %v735_v48, %v1578_v42  ;;  %1217 = vrsqrt.f32 %v699_v50  ;;  %v554_v57 = vpop.xlane.xlu1 %553  ;;  %v1623_v35 = vmul.f32 0.0078125, %v552_v43  ;;  %v751_v1 = vmul.f32 %v735_v48, %v1481_v37 }
 0x1b5   : > { %v568_v58 = vpop.xlane.xlu0 %567  ;;  %v791_v63 = vsub.f32 %v1617_v52, %v769_v51  ;;  %v700_v42 = vadd.f32 1e-05, %v683_v56  ;;  %v743_v37 = vmul.f32 %v727_v36, %v1477_v32  ;;  %v1635_v19 = vmul.f32 0.0078125, %v554_v57 }
 0x1b6   : > { %v1212_v0 = vpop.eup %1211  ;;  %v790_v4 = vsub.f32 %v1617_v52, %v768_v53  ;;  %v660_v12 = vmul.f32 %v1623_v35, %v1623_v35  ;;  %v1637_v22 = vmul.f32 0.0078125, %v568_v58 }
 0x1b7   : > { %v807_v5 = vadd.f32 %v791_v63, %v752_v61  ;;  %v728_v34 = vmul.f32 %v1212_v0, %v1599_v20  ;;  %1219 = vrsqrt.f32 %v700_v42 }
 0x1b8   : > { %v806_v6 = vadd.f32 %v790_v4, %v751_v1  ;;  %v570_v39 = vpop.xlane.xlu1 %569  ;;  %v668_v44 = vmul.f32 %v1637_v22, %v1637_v22 }
 0x1b9   : > { %v617_v8 = vpop.xlane.xlu0 %616  ;;  %v761_v10 = vmul.f32 %v728_v34, %v1584_v60  ;;  %v744_v26 = vmul.f32 %v728_v34, %v1484_v38  ;;  %v798_v60 = vadd.f32 %v782_v7, %v743_v37  ;;  %v1644_v31 = vmul.f32 0.0078125, %v570_v39 }
 0x1ba   : > { %v644_v14 = vmul.f32 0.0078125, %v617_v8  ;;  %v1079_v18 = vpack.c.bf16 %v807_v5, %v806_v6  ;;  %v661_v38 = vmul.f32 %v1635_v19, %v1635_v19 }
 0x1bb   : > { %v783_v27 = vsub.f32 %v1617_v52, %v761_v10  ;;  %v669_v57 = vmul.f32 %v1644_v31, %v1644_v31 }
 0x1bc   : > { %v676_v28 = vsub.f32 %v644_v14, %v660_v12  ;;  %v1214_v30 = vpop.eup %1213  ;;  %1099 = vst [vmem:[%s1641_s10 + $0x20] sm:$0xff] %v1079_v18   ;;  %v619_v33 = vpop.xlane.xlu1 %618 }
 0x1bd   : > { %v633_v40 = vpop.xlane.xlu0 %632  ;;  %v799_v32 = vadd.f32 %v783_v27, %v744_v26  ;;  %v729_v36 = vmul.f32 %v1214_v30, %v1599_v20  ;;  %v645_v43 = vmul.f32 0.0078125, %v619_v33 }
 0x1be   : > { %v693_v41 = vadd.f32 1e-05, %v676_v28  ;;  %v652_v45 = vmul.f32 0.0078125, %v633_v40 }
 0x1bf   : > { %v1059_v46 = vpack.c.bf16 %v799_v32, %v798_v60  ;;  %v762_v47 = vmul.f32 %v729_v36, %v1588_v2  ;;  %v677_v49 = vsub.f32 %v645_v43, %v661_v38  ;;  %v745_v42 = vmul.f32 %v729_v36, %v1500_v54 }
 0x1c0   : > { %1221 = vrsqrt.f32 %v693_v41  ;;  %v1216_v48 = vpop.eup %1215  ;;  %v684_v50 = vsub.f32 %v652_v45, %v668_v44  ;;  %v635_v51 = vpop.xlane.xlu1 %634 }
 0x1c1   : > { %v556_v53 = vpop.xlane.xlu0 %555  ;;  %v1218_v55 = vpop.eup %1217  ;;  %1060 = vst [vmem:[%s1641_s10] sm:$0xff] %v1059_v46   ;;  %v730_v56 = vmul.f32 %v1216_v48, %v1599_v20  ;;  %v653_v58 = vmul.f32 0.0078125, %v635_v51  ;;  %v694_v63 = vadd.f32 1e-05, %v677_v49  ;;  %v784_v2 = vsub.f32 %v1617_v52, %v762_v47 }
 0x1c2   : > { %v737_v61 = vmul.f32 %v1218_v55, %v1599_v20  ;;  %v701_v0 = vadd.f32 1e-05, %v684_v50  ;;  %v1661_v34 = vmul.f32 0.0078125, %v556_v53 }
 0x1c3   : > { %v763_v1 = vmul.f32 %v730_v56, %v1592_v9  ;;  %v685_v4 = vsub.f32 %v653_v58, %v669_v57  ;;  %1223 = vrsqrt.f32 %v694_v63  ;;  %v746_v8 = vmul.f32 %v730_v56, %v1508_v62 }
 0x1c4   : > { %v770_v5 = vmul.f32 %v737_v61, %v1594_v11  ;;  %v558_v6 = vpop.xlane.xlu1 %557  ;;  %v1220_v39 = vpop.eup %1219  ;;  %1225 = vrsqrt.f32 %v701_v0  ;;  %v800_v9 = vadd.f32 %v784_v2, %v745_v42  ;;  %v662_v62 = vmul.f32 %v1661_v34, %v1661_v34 }
 0x1c5   : > { %v572_v7 = vpop.xlane.xlu0 %571  ;;  %v785_v10 = vsub.f32 %v1617_v52, %v763_v1  ;;  %v702_v12 = vadd.f32 1e-05, %v685_v4  ;;  %v738_v14 = vmul.f32 %v1220_v39, %v1599_v20  ;;  %v1668_v37 = vmul.f32 0.0078125, %v558_v6 }
 0x1c6   : > { %v792_v54 = vsub.f32 %v1617_v52, %v770_v5  ;;  %v753_v60 = vmul.f32 %v737_v61, %v1503_v59  ;;  %v1675_v32 = vmul.f32 0.0078125, %v572_v7 }
 0x1c7   : > { %v801_v18 = vadd.f32 %v785_v10, %v746_v8  ;;  %1227 = vrsqrt.f32 %v702_v12  ;;  %v771_v11 = vmul.f32 %v738_v14, %v1605_v29  ;;  %v754_v33 = vmul.f32 %v738_v14, %v1513_v3 }
 0x1c8   : > { %v574_v26 = vpop.xlane.xlu1 %573  ;;  %v808_v41 = vadd.f32 %v792_v54, %v753_v60  ;;  %v663_v38 = vmul.f32 %v1668_v37, %v1668_v37  ;;  %v670_v50 = vmul.f32 %v1675_v32, %v1675_v32 }
 0x1c9   : > { %v621_v27 = vpop.xlane.xlu0 %620  ;;  %v1064_v28 = vpack.c.bf16 %v801_v18, %v800_v9  ;;  %v793_v40 = vsub.f32 %v1617_v52, %v771_v11  ;;  %v1680_v44 = vmul.f32 0.0078125, %v574_v26 }
 0x1ca   : > { %v646_v30 = vmul.f32 0.0078125, %v621_v27 }
 0x1cb   : > { %1096 = vst [vmem:[%s1641_s10 + $0x8] sm:$0xff] %v1064_v28   ;;  %v809_v43 = vadd.f32 %v793_v40, %v754_v33  ;;  %v671_v58 = vmul.f32 %v1680_v44, %v1680_v44 }
 0x1cc   : > { %v678_v36 = vsub.f32 %v646_v30, %v662_v62  ;;  %v623_v45 = vpop.xlane.xlu1 %622 }
 0x1cd   : > { %v1222_v29 = vpop.eup %1221  ;;  %v637_v46 = vpop.xlane.xlu0 %636  ;;  %v647_v47 = vmul.f32 0.0078125, %v623_v45  ;;  %v1084_v49 = vpack.c.bf16 %v809_v43, %v808_v41 }
 0x1ce   : > { %v731_v59 = vmul.f32 %v1222_v29, %v1599_v20  ;;  %v695_v3 = vadd.f32 1e-05, %v678_v36  ;;  %v654_v48 = vmul.f32 0.0078125, %v637_v46 }
 0x1cf   : > { %v679_v51 = vsub.f32 %v647_v47, %v663_v38  ;;  %1100 = vst [vmem:[%s1641_s10 + $0x28] sm:$0xff] %v1084_v49  }
 0x1d0   : > { %1229 = vrsqrt.f32 %v695_v3  ;;  %v764_v53 = vmul.f32 %v731_v59, %v1623_v35  ;;  %v686_v55 = vsub.f32 %v654_v48, %v670_v50  ;;  %v639_v56 = vpop.xlane.xlu1 %638  ;;  %v1224_v57 = vpop.eup %1223  ;;  %v747_v10 = vmul.f32 %v731_v59, %v1523_v13 }
 0x1d1   : > { %v696_v61 = vadd.f32 1e-05, %v679_v51  ;;  %v655_v63 = vmul.f32 0.0078125, %v639_v56  ;;  %v1226_v0 = vpop.eup %1225  ;;  %v732_v2 = vmul.f32 %v1224_v57, %v1599_v20 }
 0x1d2   : > { %v703_v1 = vadd.f32 1e-05, %v686_v55  ;;  %v739_v4 = vmul.f32 %v1226_v0, %v1599_v20  ;;  %v786_v6 = vsub.f32 %v1617_v52, %v764_v53 }
 0x1d3   : > { %1231 = vrsqrt.f32 %v696_v61  ;;  %v687_v42 = vsub.f32 %v655_v63, %v671_v58  ;;  %v765_v35 = vmul.f32 %v732_v2, %v1635_v19  ;;  %v748_v12 = vmul.f32 %v732_v2, %v1532_v16 }
 0x1d4   : > { %v1228_v5 = vpop.eup %1227  ;;  %1233 = vrsqrt.f32 %v703_v1  ;;  %v772_v7 = vmul.f32 %v739_v4, %v1637_v22  ;;  %v802_v19 = vadd.f32 %v786_v6, %v747_v10  ;;  %v755_v22 = vmul.f32 %v739_v4, %v1528_v15 }
 0x1d5   : > { %v740_v39 = vmul.f32 %v1228_v5, %v1599_v20  ;;  %v704_v8 = vadd.f32 1e-05, %v687_v42  ;;  %v787_v14 = vsub.f32 %v1617_v52, %v765_v35 }
 0x1d6   : > { %v794_v9 = vsub.f32 %v1617_v52, %v772_v7 }
 0x1d7   : > { %v773_v18 = vmul.f32 %v740_v39, %v1644_v31  ;;  %1235 = vrsqrt.f32 %v704_v8  ;;  %v803_v54 = vadd.f32 %v787_v14, %v748_v12  ;;  %v756_v11 = vmul.f32 %v740_v39, %v1537_v17 }
 0x1d8   : > { %v810_v13 = vadd.f32 %v794_v9, %v755_v22 }
 0x1d9   : > { %v795_v26 = vsub.f32 %v1617_v52, %v773_v18  ;;  %v1069_v27 = vpack.c.bf16 %v803_v54, %v802_v19 }
 0x1db   : > { %v811_v28 = vadd.f32 %v795_v26, %v756_v11  ;;  %1097 = vst [vmem:[%s1641_s10 + $0x10] sm:$0xff] %v1069_v27  }
 0x1dd   : > { %v1230_v16 = vpop.eup %1229  ;;  %v1089_v62 = vpack.c.bf16 %v811_v28, %v810_v13 }
 0x1de   : > { %v733_v30 = vmul.f32 %v1230_v16, %v1599_v20 }
 0x1df   : > { %1101 = vst [vmem:[%s1641_s10 + $0x30] sm:$0xff] %v1089_v62  }
 0x1e0   : > { %v766_v31 = vmul.f32 %v733_v30, %v1661_v34  ;;  %v1232_v60 = vpop.eup %1231  ;;  %v749_v43 = vmul.f32 %v733_v30, %v1547_v21 }
 0x1e1   : > { %v1234_v33 = vpop.eup %1233  ;;  %v734_v40 = vmul.f32 %v1232_v60, %v1599_v20 }
 0x1e2   : > { %v741_v15 = vmul.f32 %v1234_v33, %v1599_v20  ;;  %v788_v17 = vsub.f32 %v1617_v52, %v766_v31 }
 0x1e3   : > { %v767_v36 = vmul.f32 %v734_v40, %v1668_v37  ;;  %v750_v34 = vmul.f32 %v734_v40, %v1556_v24 }
 0x1e4   : > { %v1236_v29 = vpop.eup %1235  ;;  %v774_v41 = vmul.f32 %v741_v15, %v1675_v32  ;;  %v804_v46 = vadd.f32 %v788_v17, %v749_v43  ;;  %v757_v32 = vmul.f32 %v741_v15, %v1552_v23 }
 0x1e5   : > { %v789_v38 = vsub.f32 %v1617_v52, %v767_v36  ;;  %v742_v45 = vmul.f32 %v1236_v29, %v1599_v20 }
 0x1e6   : > { %v796_v3 = vsub.f32 %v1617_v52, %v774_v41 }
 0x1e7   : > { %v805_v59 = vadd.f32 %v789_v38, %v750_v34  ;;  %v775_v37 = vmul.f32 %v742_v45, %v1680_v44  ;;  %v758_v21 = vmul.f32 %v742_v45, %v1561_v25 }
 0x1e8   : > { %v812_v20 = vadd.f32 %v796_v3, %v757_v32 }
 0x1e9   : > { %v1074_v47 = vpack.c.bf16 %v805_v59, %v804_v46  ;;  %v797_v24 = vsub.f32 %v1617_v52, %v775_v37 }
 0x1eb   : > { %1098 = vst [vmem:[%s1641_s10 + $0x18] sm:$0xff] %v1074_v47   ;;  %v813_v48 = vadd.f32 %v797_v24, %v758_v21 }
 0x1ed   : > { %v1094_v23 = vpack.c.bf16 %v813_v48, %v812_v20 }
 0x1ef   : > { %1102 = vst [vmem:[%s1641_s10 + $0x38] sm:$0xff] %v1094_v23  }
 0x1f0   : > { %1250 = shalt.err (!%p1247_p3)
}
 0x1f1   : > { %s1251_s17 = scalar_lea.hbm %s1727_s15, 1024  ;;  %s1255_s7 = scalar_lea.hbm %s1779_s5, 8192 }
 0x1f2   : > { %p1252_p4 = scmp.ne.s32.totalorder %s1727_s15, %s1251_s17  ;;  %p1256_p9 = scmp.lt.s32.totalorder %s1727_s15, %s1779_s5 }
 0x1f3   : > { %p1257_p10 = scmp.lt.s32.totalorder %s1255_s7, %s1251_s17 }
 0x1f4   : > { %p1253_p7 = pnand %p1252_p4, %p1371_p5 }
 0x1f5   : > { %p1258_p11 = por %p1257_p10, %p1256_p9 }
 0x1f6   : > { %p1254_p8 = pneg %p1253_p7 }
 0x1f8   : > { %p1259_p12 = pnand %p1258_p11, %p1254_p8 }
 0x1fa   : > { %1262 = shalt.err (!%p1259_p12)
}
 0x1fb   : > { %s1301_s10 = smov 64   ;;  %s1302_s11 = smov 4  }
 0x1fc   : > { %1127 = dma.vmem_to_hbm [thread:$0]  (%p1371_p5), %s1729_s12, 1024, %s1727_s15, %s1734_s16, %s1301_s10, %s1301_s10, %s1302_s11  }
 0x1fd PF: > { %p1133_p13 = scmp.ge.s32.totalorder %s1297_s21, 2  ;;  %s923_s13 = sand.u32 1, %s1285_s18  }
 0x1fe   : > { %s924_s14 = scalar_lea.sflag [#allocation3], %s923_s13 }
 0x1ff   : > { %p1130_p0 = pnand %p1133_p13, %p1375_p6 }
 0x201   : > { %p1131_p1 = pneg %p1130_p0 }
 0x203   : > { %1280 = dma.done.wait (%p1131_p1), %s924_s14, 1024  }
 0x204   : > { %1282 = vsyncadd (%p1131_p1), %s924_s14, 4294966272  ;;  %p15_p2 = scmp.ge.s32.totalorder %s1358_s24, 10   ;;  %s1782_s18 = smov %s1289_s19 }
 0x205   : > { %s1783_s19 = smov %s1293_s20  ;;  %s1784_s20 = smov %s1369_s27 }
 0x206   : > { %s1785_s21 = smov %s1358_s24  ;;  %17 = sbr.rel (!%p15_p2) target bundleno = 3 (0x3), region = 75 }
 0x20b   :  { %929 = vsyncpa [#allocation3], 1 }
 0x20c   :  { %931 = vsyncpa [#allocation3 + $0x1], 1 }

</bundles_post_ra>
